<compile_context>
chip_gen: v7x
topology: tpu7x:2x2x1
jax: 0.10.0
libtpu: 0.0.40
codegen_flags: <defaults>
</compile_context>

<pallas_src>
import jax
import jax.numpy as jnp
from jax.experimental import pallas as pl
from jax.experimental.pallas import tpu as pltpu

_LN_EPS = 1e-5
_MAX_POOL_CHUNK = 256          # max sublanes upcast to f32 at once inside the pool
_VMEM_SLACK_BYTES = 4 << 20    # headroom for Mosaic internal scratch


# ----------------------------------------------------------------------------
# Helpers shared by the kernel and the wrapper-side VMEM accounting
# ----------------------------------------------------------------------------
def _pool_chunk(S):
    """Sequence-chunk size used for the f32 pooling reduction."""
    if S <= _MAX_POOL_CHUNK:
        return S
    for c in (_MAX_POOL_CHUNK, 128, 64, 32, 16, 8):
        if S % c == 0:
            return c
    return S


def _pick_vmem_limit():
    """Generation-aware VMEM limit: ~7/8 of capacity, clamped to a safe range."""
    cap = 64 << 20                       # conservative default (v7x per-core VMEM)
    try:
        info_cap = int(pltpu.get_tpu_info().vmem_capacity_bytes)
        if info_cap > 0:
            cap = info_cap
    except Exception:
        pass
    return int(min(max(cap - cap // 8, 32 << 20), 112 << 20))


def _choose_batch_tile(B, per_row_bytes, resident_bytes, vmem_limit):
    """Largest batch tile that fits the VMEM budget, with >=2 grid steps when B>8.

    Output BlockSpec second-to-last dim must be a multiple of 8 or equal B.
    """
    if B <= 8:
        return B
    budget = vmem_limit - resident_bytes - _VMEM_SLACK_BYTES
    rows = max(int(budget // max(per_row_bytes, 1)), 8)
    # Cap so the grid has at least 2 steps: megacore sharding on v7x and
    # DMA/compute overlap everywhere.
    half = ((((B + 1) // 2) + 7) // 8) * 8
    tb = min(rows, half, B)
    return max((tb // 8) * 8, 8)


def _compiler_params(vmem_limit):
    return pltpu.CompilerParams(
        dimension_semantics=("parallel",),   # megacore sharding of the batch grid
        vmem_limit_bytes=int(vmem_limit),
    )


# ----------------------------------------------------------------------------
# Kernels
# ----------------------------------------------------------------------------
def _masked_mean_pool(h_ref, len_ref):
    """h_ref: [TB, S, H] Ref (any float dtype), len_ref: [TB, 1] int32 lengths.

    Returns the masked mean over the sequence as a [TB, H] f32 array.
    The prefix mask is rebuilt in-kernel from the lengths (iota < length);
    the per-row counts are the lengths themselves.
    """
    TB, S, H = h_ref.shape
    lens = len_ref[...]                                        # [TB, 1] int32
    chunk = _pool_chunk(S)
    n_chunks = S // chunk

    def chunk_sum(start, acc):
        h = h_ref[:, pl.ds(start, chunk), :].astype(jnp.float32)   # [TB, c, H] f32
        pos = start + jax.lax.broadcasted_iota(jnp.int32, (TB, chunk, H), 1)
        h = jnp.where(pos < lens[:, :, None], h, 0.0)
        return acc + jnp.sum(h, axis=1)                             # [TB, H] f32

    zero = jnp.zeros((TB, H), jnp.float32)
    if n_chunks == 1:
        summed = chunk_sum(0, zero)
    else:
        summed = jax.lax.fori_loop(
            0, n_chunks,
            lambda ci, acc: chunk_sum(pl.multiple_of(ci * chunk, chunk), acc),
            zero,
            unroll=n_chunks <= 8)
    counts = jnp.maximum(lens.astype(jnp.float32), 1.0)             # [TB, 1]
    return summed / counts                                          # exact divide


def _dual_pool_kernel(qh_ref, ql_ref, rh_ref, rl_ref, q_out_ref, r_out_ref):
    """Siamese / no-mapper case: both outputs are plain masked mean pools."""
    q_out_ref[...] = _masked_mean_pool(qh_ref, ql_ref).astype(q_out_ref.dtype)
    r_out_ref[...] = _masked_mean_pool(rh_ref, rl_ref).astype(r_out_ref.dtype)


def _dual_mapper_kernel(qh_ref, ql_ref, rh_ref, rl_ref,
                        w1_ref, b1_ref, g_ref, beta_ref, w2_ref, b2_ref,
                        q_out_ref, r_out_ref):
    # ---- response path: masked mean pool only ----
    r_out_ref[...] = _masked_mean_pool(rh_ref, rl_ref).astype(r_out_ref.dtype)

    # ---- query path: pool -> Linear(Hq->Hm) -> LayerNorm -> (Dropout=id) -> Linear(Hm->Hr)
    pooled = _masked_mean_pool(qh_ref, ql_ref)                        # [TB, Hq] f32

    z = jnp.dot(pooled.astype(w1_ref.dtype), w1_ref[...],
                preferred_element_type=jnp.float32) + b1_ref[...]     # [TB, Hm] f32
    mu = jnp.mean(z, axis=-1, keepdims=True)
    var = jnp.mean(jnp.square(z - mu), axis=-1, keepdims=True)
    zn = (z - mu) * jax.lax.rsqrt(var + _LN_EPS)
    zn = zn * g_ref[...] + beta_ref[...]
    # Dropout(p=0.1): eval-mode identity.
    out = jnp.dot(zn.astype(w2_ref.dtype), w2_ref[...],
                  preferred_element_type=jnp.float32) + b2_ref[...]   # [TB, Hr] f32
    q_out_ref[...] = out.astype(q_out_ref.dtype)


# ----------------------------------------------------------------------------
# Wrapper: tiling / pallas_call plumbing
# ----------------------------------------------------------------------------
def dual_forward(qh, q_len, rh, r_len, params=None):
    """qh: [B, Sq, Hq] (embedder dtype), q_len: [B, 1] int32,
    rh: [B, Sr, Hr], r_len: [B, 1] int32.

    Returns (query_embeddings, response_embeddings), both f32.
    """
    B, Sq, Hq = qh.shape
    _, Sr, Hr = rh.shape
    a_q = jnp.dtype(qh.dtype).itemsize
    a_r = jnp.dtype(rh.dtype).itemsize
    lane = 128

    cq, cr = _pool_chunk(Sq), _pool_chunk(Sr)
    # Per-batch-row VMEM: double-buffered activations + lane-padded length
    # columns + f32 pooling temporaries + double-buffered f32 outputs.
    per_row = (2 * (Sq * Hq * a_q + Sr * Hr * a_r)
               + 2 * 2 * lane * 4
               + 4 * (cq * Hq + cr * Hr)
               + 4 * (Hq + Hr)
               + 2 * 2 * max(Hr, lane) * 4)

    resident = 0
    weight_bytes = 0
    if params is not None:
        w1, b1, g, beta, w2, b2 = (params["w1"], params["b1"], params["gamma"],
                                   params["beta"], params["w2"], params["b2"])
        Hm = w1.shape[1]
        weight_bytes = (w1.size * jnp.dtype(w1.dtype).itemsize
                        + w2.size * jnp.dtype(w2.dtype).itemsize
                        + (b1.size + g.size + beta.size + b2.size) * 4)
        # TODO(synk): weights have constant index_maps so pipeline_mode=pl.Buffered(1)
        # would single-buffer them; kept at the default double buffering for compile
        # safety and accounted for at 2x in the budget instead.
        resident = 2 * weight_bytes
        per_row += 2 * Hm * 4                      # z / zn mapper temporaries

    vmem_limit = _pick_vmem_limit()
    tb = _choose_batch_tile(B, per_row, resident, vmem_limit)
    grid = (pl.cdiv(B, tb),)

    act_specs = [
        pl.BlockSpec((tb, Sq, Hq), lambda i: (i, 0, 0)),
        pl.BlockSpec((tb, 1), lambda i: (i, 0)),
        pl.BlockSpec((tb, Sr, Hr), lambda i: (i, 0, 0)),
        pl.BlockSpec((tb, 1), lambda i: (i, 0)),
    ]

    # HBM-bound cost hint for XLA's scheduler around this custom call.
    io_bytes = int(B * (Sq * Hq * a_q + Sr * Hr * a_r) + 2 * B * 4 + weight_bytes)
    flops = int(2 * B * (Sq * Hq + Sr * Hr))

    if params is None:
        # No query mapper: both outputs are pooled embeddings.
        # TODO(synk): if Hq/Hr are not multiples of 128, padding the output width
        # and slicing in the wrapper would keep the epilogue stores lane-dense.
        out_shape = (jax.ShapeDtypeStruct((B, Hq), jnp.float32),
                     jax.ShapeDtypeStruct((B, Hr), jnp.float32))
        out_specs = (pl.BlockSpec((tb, Hq), lambda i: (i, 0)),
                     pl.BlockSpec((tb, Hr), lambda i: (i, 0)))
        cost = pl.CostEstimate(flops=flops, transcendentals=0,
                               bytes_accessed=io_bytes + B * (Hq + Hr) * 4)
        grid_spec = pltpu.PrefetchScalarGridSpec(
            num_scalar_prefetch=0, grid=grid,
            in_specs=act_specs, out_specs=out_specs)
        return pl.pallas_call(
            _dual_pool_kernel, out_shape=out_shape, grid_spec=grid_spec,
            compiler_params=_compiler_params(vmem_limit),
            cost_estimate=cost,
        )(qh, q_len, rh, r_len)

    const2d = lambda i: (0, 0)   # weights: resident block, same tile every step
    weight_specs = [
        pl.BlockSpec((Hq, Hm), const2d),
        pl.BlockSpec((1, Hm), const2d),
        pl.BlockSpec((1, Hm), const2d),
        pl.BlockSpec((1, Hm), const2d),
        pl.BlockSpec((Hm, Hr), const2d),
        pl.BlockSpec((1, Hr), const2d),
    ]
    out_shape = (jax.ShapeDtypeStruct((B, Hr), jnp.float32),
                 jax.ShapeDtypeStruct((B, Hr), jnp.float32))
    out_specs = (pl.BlockSpec((tb, Hr), lambda i: (i, 0)),
                 pl.BlockSpec((tb, Hr), lambda i: (i, 0)))
    cost = pl.CostEstimate(
        flops=flops + int(2 * B * (Hq * Hm + Hm * Hr)),
        transcendentals=int(B),
        bytes_accessed=io_bytes + 2 * B * Hr * 4)
    grid_spec = pltpu.PrefetchScalarGridSpec(
        num_scalar_prefetch=0, grid=grid,
        in_specs=act_specs + weight_specs, out_specs=out_specs)
    return pl.pallas_call(
        _dual_mapper_kernel, out_shape=out_shape, grid_spec=grid_spec,
        compiler_params=_compiler_params(vmem_limit),
        cost_estimate=cost,
    )(qh, q_len, rh, r_len, w1, b1, g, beta, w2, b2)


# ----------------------------------------------------------------------------
# Model wrapper (embedder outputs are inputs; pooling + mapper run in Pallas)
# ----------------------------------------------------------------------------
class DualTransformerPallas:
    def __init__(self, query_embedding_size, response_embedding_size,
                 query_mapper_hidden_size, key,
                 include_query_mapper_regardless=False,
                 weight_dtype=jnp.bfloat16):
        self.query_embedding_size = query_embedding_size
        self.response_embedding_size = response_embedding_size
        self.needs_query_mapper = (query_embedding_size != response_embedding_size
                                   or include_query_mapper_regardless)
        self.params = None
        if self.needs_query_mapper:
            Hq, Hm, Hr = (query_embedding_size, query_mapper_hidden_size,
                          response_embedding_size)
            k1, k2, k3, k4 = jax.random.split(key, 4)
            lim1 = 1.0 / (Hq ** 0.5)   # nn.Linear uniform(-1/sqrt(fan_in), ...)
            lim2 = 1.0 / (Hm ** 0.5)
            self.params = {
                "w1": jax.random.uniform(k1, (Hq, Hm), jnp.float32,
                                         -lim1, lim1).astype(weight_dtype),
                "b1": jax.random.uniform(k2, (1, Hm), jnp.float32, -lim1, lim1),
                "gamma": jnp.ones((1, Hm), jnp.float32),
                "beta": jnp.zeros((1, Hm), jnp.float32),
                "w2": jax.random.uniform(k3, (Hm, Hr), jnp.float32,
                                         -lim2, lim2).astype(weight_dtype),
                "b2": jax.random.uniform(k4, (1, Hr), jnp.float32, -lim2, lim2),
            }

    def __call__(self, query_hidden, query_mask, response_hidden, response_mask):
        # Hidden states travel in the embedder's own dtype: no standalone
        # f32->bf16 HBM pass on the dominant [B, S, H] tensors.
        # HF tokenizer attention_masks are prefix/padding masks, so per-row
        # lengths fully determine them: only [B, 1] int32 lengths reach the
        # kernel (no dense mask DMA / lane-padded VMEM blow-up).
        q_len = jnp.sum(query_mask.astype(jnp.int32), axis=-1, keepdims=True)
        r_len = jnp.sum(response_mask.astype(jnp.int32), axis=-1, keepdims=True)
        return dual_forward(query_hidden, q_len, response_hidden, r_len, self.params)


# ----------------------------------------------------------------------------
# Pure-JAX reference (mirrors kernel numerics: f32 math, bf16 matmul operands)
# ----------------------------------------------------------------------------
def _ref_forward(model, qh, qm, rh, rm):
    def pool(h, m):
        h = h.astype(jnp.float32)
        m = m.astype(jnp.float32)[:, :, None]
        s = jnp.sum(h * m, axis=1)
        c = jnp.maximum(jnp.sum(m, axis=1), 1.0)
        return s / c

    q = pool(qh, qm)
    r = pool(rh, rm)
    if model.needs_query_mapper:
        p = model.params
        z = jnp.dot(q.astype(p["w1"].dtype), p["w1"],
                    preferred_element_type=jnp.float32) + p["b1"]
        mu = jnp.mean(z, axis=-1, keepdims=True)
        var = jnp.mean((z - mu) ** 2, axis=-1, keepdims=True)
        zn = (z - mu) * jax.lax.rsqrt(var + _LN_EPS) * p["gamma"] + p["beta"]
        q = jnp.dot(zn.astype(p["w2"].dtype), p["w2"],
                    preferred_element_type=jnp.float32) + p["b2"]
    return q, r


if __name__ == "__main__":
    key = jax.random.PRNGKey(0)
    k_model, k_qh, k_rh = jax.random.split(key, 3)

    B = 2
    Sq, Sr = 8, 16
    Hq, Hr, Hm = 32, 64, 128   # Hq != Hr -> query_mapper is used; Hm stands in for 2048

    model = DualTransformerPallas(Hq, Hr, Hm, k_model)

    # Simulated transformer last_hidden_state outputs (bf16, the embedder dtype)
    # and HF-style attention masks.
    query_hidden = jax.random.normal(k_qh, (B, Sq, Hq), jnp.float32).astype(jnp.bfloat16)
    response_hidden = jax.random.normal(k_rh, (B, Sr, Hr), jnp.float32).astype(jnp.bfloat16)
    query_mask = jnp.array([[1, 1, 1, 1, 1, 0, 0, 0],
                            [1, 1, 1, 1, 1, 1, 1, 1]], dtype=jnp.int32)
    response_mask = jnp.array([[1] * 12 + [0] * 4,
                               [1] * 5 + [0] * 11], dtype=jnp.int32)

    q_emb, r_emb = model(query_hidden, query_mask, response_hidden, response_mask)
    q_emb = jax.block_until_ready(q_emb)
    r_emb = jax.block_until_ready(r_emb)

    q_ref, r_ref = _ref_forward(model, query_hidden, query_mask,
                                response_hidden, response_mask)
    assert q_emb.shape == (B, Hr) and r_emb.shape == (B, Hr)
    assert jnp.allclose(q_emb, q_ref, atol=2e-2, rtol=2e-2), \
        float(jnp.max(jnp.abs(q_emb - q_ref)))
    assert jnp.allclose(r_emb, r_ref, atol=2e-2, rtol=2e-2), \
        float(jnp.max(jnp.abs(r_emb - r_ref)))

    # Siamese / no-mapper path (Hq == Hr): both outputs are masked mean pools.
    model_siamese = DualTransformerPallas(Hr, Hr, Hm, k_model)
    q2, r2 = model_siamese(response_hidden, response_mask,
                           response_hidden, response_mask)
    q2 = jax.block_until_ready(q2)
    r2 = jax.block_until_ready(r2)
    q2_ref, r2_ref = _ref_forward(model_siamese, response_hidden, response_mask,
                                  response_hidden, response_mask)
    assert jnp.allclose(q2, q2_ref, atol=2e-2, rtol=2e-2)
    assert jnp.allclose(r2, r2_ref, atol=2e-2, rtol=2e-2)

    print("KERNEL_OK")
</pallas_src>

<mosaic_0001>
module attributes {stable_mosaic.version = 11 : i64} {
  func.func @_dual_mapper_kernel(%arg0: i32, %arg1: memref<2x8x32xbf16, #tpu.memory_space<vmem>>, %arg2: memref<2x1xi32, #tpu.memory_space<vmem>>, %arg3: memref<2x16x64xbf16, #tpu.memory_space<vmem>>, %arg4: memref<2x1xi32, #tpu.memory_space<vmem>>, %arg5: memref<32x128xbf16, #tpu.memory_space<vmem>>, %arg6: memref<1x128xf32, #tpu.memory_space<vmem>>, %arg7: memref<1x128xf32, #tpu.memory_space<vmem>>, %arg8: memref<1x128xf32, #tpu.memory_space<vmem>>, %arg9: memref<128x64xbf16, #tpu.memory_space<vmem>>, %arg10: memref<1x64xf32, #tpu.memory_space<vmem>>, %arg11: memref<2x64xf32, #tpu.memory_space<vmem>>, %arg12: memref<2x64xf32, #tpu.memory_space<vmem>>) attributes {dimension_semantics = [#tpu.dimension_semantics<parallel>], iteration_bounds = array<i64: 1>, scalar_prefetch = 0 : i64, scratch_operands = 0 : i64, tpu.core_type = #tpu.core_type<tc>, window_params = [{transform_indices = @transform_0, window_bounds = array<i64: 2, 8, 32>}, {transform_indices = @transform_1, window_bounds = array<i64: 2, 1>}, {transform_indices = @transform_2, window_bounds = array<i64: 2, 16, 64>}, {transform_indices = @transform_3, window_bounds = array<i64: 2, 1>}, {pipeline_mode = #tpu.pipeline_mode<synchronous>, transform_indices = @transform_4, window_bounds = array<i64: 32, 128>}, {pipeline_mode = #tpu.pipeline_mode<synchronous>, transform_indices = @transform_5, window_bounds = array<i64: 1, 128>}, {pipeline_mode = #tpu.pipeline_mode<synchronous>, transform_indices = @transform_6, window_bounds = array<i64: 1, 128>}, {pipeline_mode = #tpu.pipeline_mode<synchronous>, transform_indices = @transform_7, window_bounds = array<i64: 1, 128>}, {pipeline_mode = #tpu.pipeline_mode<synchronous>, transform_indices = @transform_8, window_bounds = array<i64: 128, 64>}, {pipeline_mode = #tpu.pipeline_mode<synchronous>, transform_indices = @transform_9, window_bounds = array<i64: 1, 64>}, {transform_indices = @transform_10, window_bounds = array<i64: 2, 64>}, {transform_indices = @transform_11, window_bounds = array<i64: 2, 64>}]} {
    %c0 = arith.constant 0 : index
    %c0_0 = arith.constant 0 : index
    %0 = vector.load %arg4[%c0, %c0_0] : memref<2x1xi32, #tpu.memory_space<vmem>>, vector<2x1xi32>
    %cst = arith.constant 0.000000e+00 : f32
    %1 = vector.broadcast %cst : f32 to vector<2x64xf32>
    %c0_1 = arith.constant 0 : index
    %c0_2 = arith.constant 0 : index
    %c0_3 = arith.constant 0 : index
    %2 = vector.load %arg3[%c0_1, %c0_2, %c0_3] : memref<2x16x64xbf16, #tpu.memory_space<vmem>>, vector<2x16x64xbf16>
    %3 = arith.extf %2 : vector<2x16x64xbf16> to vector<2x16x64xf32>
    %4 = tpu.iota {dimensions = array<i32: 1>} : vector<2x16x64xi32>
    %c0_i32 = arith.constant 0 : i32
    %5 = vector.broadcast %c0_i32 : i32 to vector<2x16x64xi32>
    %6 = arith.addi %5, %4 : vector<2x16x64xi32>
    %7 = vector.shape_cast %0 : vector<2x1xi32> to vector<2x1x1xi32>
    %8 = vector.broadcast %7 : vector<2x1x1xi32> to vector<2x16x64xi32>
    %9 = arith.cmpi slt, %6, %8 : vector<2x16x64xi32>
    %cst_4 = arith.constant 0.000000e+00 : f32
    %10 = vector.broadcast %cst_4 : f32 to vector<2x16x64xf32>
    %11 = arith.select %9, %3, %10 : vector<2x16x64xi1>, vector<2x16x64xf32>
    %cst_5 = arith.constant dense<0.000000e+00> : vector<2x64xf32>
    %12 = vector.multi_reduction <add>, %11, %cst_5 [1] : vector<2x16x64xf32> to vector<2x64xf32>
    %13 = arith.addf %1, %12 : vector<2x64xf32>
    %14 = arith.sitofp %0 : vector<2x1xi32> to vector<2x1xf32>
    %cst_6 = arith.constant 1.000000e+00 : f32
    %15 = vector.broadcast %cst_6 : f32 to vector<2x1xf32>
    %16 = arith.maximumf %14, %15 : vector<2x1xf32>
    %17 = vector.broadcast %16 : vector<2x1xf32> to vector<2x64xf32>
    %18 = arith.divf %13, %17 : vector<2x64xf32>
    %c0_7 = arith.constant 0 : index
    %c0_8 = arith.constant 0 : index
    %19 = vector.load %arg12[%c0_7, %c0_8] : memref<2x64xf32, #tpu.memory_space<vmem>>, vector<2x64xf32>
    tpu.vector_store %arg12[%c0_7, %c0_8], %18 {strides = array<i32>} : memref<2x64xf32, #tpu.memory_space<vmem>>, vector<2x64xf32>,
    %c0_9 = arith.constant 0 : index
    %c0_10 = arith.constant 0 : index
    %20 = vector.load %arg2[%c0_9, %c0_10] : memref<2x1xi32, #tpu.memory_space<vmem>>, vector<2x1xi32>
    %cst_11 = arith.constant 0.000000e+00 : f32
    %21 = vector.broadcast %cst_11 : f32 to vector<2x32xf32>
    %c0_12 = arith.constant 0 : index
    %c0_13 = arith.constant 0 : index
    %c0_14 = arith.constant 0 : index
    %22 = vector.load %arg1[%c0_12, %c0_13, %c0_14] : memref<2x8x32xbf16, #tpu.memory_space<vmem>>, vector<2x8x32xbf16>
    %23 = arith.extf %22 : vector<2x8x32xbf16> to vector<2x8x32xf32>
    %24 = tpu.iota {dimensions = array<i32: 1>} : vector<2x8x32xi32>
    %c0_i32_15 = arith.constant 0 : i32
    %25 = vector.broadcast %c0_i32_15 : i32 to vector<2x8x32xi32>
    %26 = arith.addi %25, %24 : vector<2x8x32xi32>
    %27 = vector.shape_cast %20 : vector<2x1xi32> to vector<2x1x1xi32>
    %28 = vector.broadcast %27 : vector<2x1x1xi32> to vector<2x8x32xi32>
    %29 = arith.cmpi slt, %26, %28 : vector<2x8x32xi32>
    %cst_16 = arith.constant 0.000000e+00 : f32
    %30 = vector.broadcast %cst_16 : f32 to vector<2x8x32xf32>
    %31 = arith.select %29, %23, %30 : vector<2x8x32xi1>, vector<2x8x32xf32>
    %cst_17 = arith.constant dense<0.000000e+00> : vector<2x32xf32>
    %32 = vector.multi_reduction <add>, %31, %cst_17 [1] : vector<2x8x32xf32> to vector<2x32xf32>
    %33 = arith.addf %21, %32 : vector<2x32xf32>
    %34 = arith.sitofp %20 : vector<2x1xi32> to vector<2x1xf32>
    %cst_18 = arith.constant 1.000000e+00 : f32
    %35 = vector.broadcast %cst_18 : f32 to vector<2x1xf32>
    %36 = arith.maximumf %34, %35 : vector<2x1xf32>
    %37 = vector.broadcast %36 : vector<2x1xf32> to vector<2x32xf32>
    %38 = arith.divf %33, %37 : vector<2x32xf32>
    %39 = arith.truncf %38 : vector<2x32xf32> to vector<2x32xbf16>
    %c0_19 = arith.constant 0 : index
    %c0_20 = arith.constant 0 : index
    %40 = vector.load %arg5[%c0_19, %c0_20] : memref<32x128xbf16, #tpu.memory_space<vmem>>, vector<32x128xbf16>
    %cst_21 = arith.constant dense<0.000000e+00> : vector<2x128xf32>
    %41 = tpu.matmul %39, %40, %cst_21 {dimension_numbers = #tpu.dot_dimension_numbers<[1], [0], [0], [1], [0, 0, 1, 1], [], []>} : vector<2x32xbf16>, vector<32x128xbf16>, vector<2x128xf32> -> vector<2x128xf32>
    %c0_22 = arith.constant 0 : index
    %c0_23 = arith.constant 0 : index
    %42 = vector.load %arg6[%c0_22, %c0_23] : memref<1x128xf32, #tpu.memory_space<vmem>>, vector<1x128xf32>
    %43 = vector.broadcast %42 : vector<1x128xf32> to vector<2x128xf32>
    %44 = arith.addf %41, %43 : vector<2x128xf32>
    %cst_24 = arith.constant dense<0.000000e+00> : vector<2xf32>
    %45 = vector.multi_reduction <add>, %44, %cst_24 [1] : vector<2x128xf32> to vector<2xf32>
    %46 = vector.shape_cast %45 : vector<2xf32> to vector<2x1xf32>
    %cst_25 = arith.constant 1.280000e+02 : f32
    %47 = vector.broadcast %cst_25 : f32 to vector<2x1xf32>
    %48 = arith.divf %46, %47 : vector<2x1xf32>
    %49 = vector.broadcast %48 : vector<2x1xf32> to vector<2x128xf32>
    %50 = arith.subf %44, %49 : vector<2x128xf32>
    %51 = arith.mulf %50, %50 : vector<2x128xf32>
    %cst_26 = arith.constant dense<0.000000e+00> : vector<2xf32>
    %52 = vector.multi_reduction <add>, %51, %cst_26 [1] : vector<2x128xf32> to vector<2xf32>
    %53 = vector.shape_cast %52 : vector<2xf32> to vector<2x1xf32>
    %cst_27 = arith.constant 1.280000e+02 : f32
    %54 = vector.broadcast %cst_27 : f32 to vector<2x1xf32>
    %55 = arith.divf %53, %54 : vector<2x1xf32>
    %56 = vector.broadcast %48 : vector<2x1xf32> to vector<2x128xf32>
    %57 = arith.subf %44, %56 : vector<2x128xf32>
    %cst_28 = arith.constant 9.99999974E-6 : f32
    %58 = vector.broadcast %cst_28 : f32 to vector<2x1xf32>
    %59 = arith.addf %55, %58 : vector<2x1xf32>
    %60 = math.rsqrt %59 : vector<2x1xf32>
    %61 = vector.broadcast %60 : vector<2x1xf32> to vector<2x128xf32>
    %62 = arith.mulf %57, %61 : vector<2x128xf32>
    %c0_29 = arith.constant 0 : index
    %c0_30 = arith.constant 0 : index
    %63 = vector.load %arg7[%c0_29, %c0_30] : memref<1x128xf32, #tpu.memory_space<vmem>>, vector<1x128xf32>
    %64 = vector.broadcast %63 : vector<1x128xf32> to vector<2x128xf32>
    %65 = arith.mulf %62, %64 : vector<2x128xf32>
    %c0_31 = arith.constant 0 : index
    %c0_32 = arith.constant 0 : index
    %66 = vector.load %arg8[%c0_31, %c0_32] : memref<1x128xf32, #tpu.memory_space<vmem>>, vector<1x128xf32>
    %67 = vector.broadcast %66 : vector<1x128xf32> to vector<2x128xf32>
    %68 = arith.addf %65, %67 : vector<2x128xf32>
    %69 = arith.truncf %68 : vector<2x128xf32> to vector<2x128xbf16>
    %c0_33 = arith.constant 0 : index
    %c0_34 = arith.constant 0 : index
    %70 = vector.load %arg9[%c0_33, %c0_34] : memref<128x64xbf16, #tpu.memory_space<vmem>>, vector<128x64xbf16>
    %cst_35 = arith.constant dense<0.000000e+00> : vector<2x64xf32>
    %71 = tpu.matmul %69, %70, %cst_35 {dimension_numbers = #tpu.dot_dimension_numbers<[1], [0], [0], [1], [0, 0, 1, 1], [], []>} : vector<2x128xbf16>, vector<128x64xbf16>, vector<2x64xf32> -> vector<2x64xf32>
    %c0_36 = arith.constant 0 : index
    %c0_37 = arith.constant 0 : index
    %72 = vector.load %arg10[%c0_36, %c0_37] : memref<1x64xf32, #tpu.memory_space<vmem>>, vector<1x64xf32>
    %73 = vector.broadcast %72 : vector<1x64xf32> to vector<2x64xf32>
    %74 = arith.addf %71, %73 : vector<2x64xf32>
    %c0_38 = arith.constant 0 : index
    %c0_39 = arith.constant 0 : index
    %75 = vector.load %arg11[%c0_38, %c0_39] : memref<2x64xf32, #tpu.memory_space<vmem>>, vector<2x64xf32>
    tpu.vector_store %arg11[%c0_38, %c0_39], %74 {strides = array<i32>} : memref<2x64xf32, #tpu.memory_space<vmem>>, vector<2x64xf32>,
    return
  }
  func.func @transform_0(%arg0: i32) -> (i32, i32, i32) {
    %c0_i32 = arith.constant 0 : i32
    %c0_i32_0 = arith.constant 0 : i32
    %c0_i32_1 = arith.constant 0 : i32
    return %arg0, %c0_i32, %c0_i32_0 : i32, i32, i32
  }
  func.func @transform_1(%arg0: i32) -> (i32, i32) {
    %c0_i32 = arith.constant 0 : i32
    %c0_i32_0 = arith.constant 0 : i32
    return %arg0, %c0_i32 : i32, i32
  }
  func.func @transform_2(%arg0: i32) -> (i32, i32, i32) {
    %c0_i32 = arith.constant 0 : i32
    %c0_i32_0 = arith.constant 0 : i32
    %c0_i32_1 = arith.constant 0 : i32
    return %arg0, %c0_i32, %c0_i32_0 : i32, i32, i32
  }
  func.func @transform_3(%arg0: i32) -> (i32, i32) {
    %c0_i32 = arith.constant 0 : i32
    %c0_i32_0 = arith.constant 0 : i32
    return %arg0, %c0_i32 : i32, i32
  }
  func.func @transform_4(%arg0: i32) -> (i32, i32) {
    %c0_i32 = arith.constant 0 : i32
    %c0_i32_0 = arith.constant 0 : i32
    %c0_i32_1 = arith.constant 0 : i32
    return %c0_i32, %c0_i32_0 : i32, i32
  }
  func.func @transform_5(%arg0: i32) -> (i32, i32) {
    %c0_i32 = arith.constant 0 : i32
    %c0_i32_0 = arith.constant 0 : i32
    %c0_i32_1 = arith.constant 0 : i32
    return %c0_i32, %c0_i32_0 : i32, i32
  }
  func.func @transform_6(%arg0: i32) -> (i32, i32) {
    %c0_i32 = arith.constant 0 : i32
    %c0_i32_0 = arith.constant 0 : i32
    %c0_i32_1 = arith.constant 0 : i32
    return %c0_i32, %c0_i32_0 : i32, i32
  }
  func.func @transform_7(%arg0: i32) -> (i32, i32) {
    %c0_i32 = arith.constant 0 : i32
    %c0_i32_0 = arith.constant 0 : i32
    %c0_i32_1 = arith.constant 0 : i32
    return %c0_i32, %c0_i32_0 : i32, i32
  }
  func.func @transform_8(%arg0: i32) -> (i32, i32) {
    %c0_i32 = arith.constant 0 : i32
    %c0_i32_0 = arith.constant 0 : i32
    %c0_i32_1 = arith.constant 0 : i32
    return %c0_i32, %c0_i32_0 : i32, i32
  }
  func.func @transform_9(%arg0: i32) -> (i32, i32) {
    %c0_i32 = arith.constant 0 : i32
    %c0_i32_0 = arith.constant 0 : i32
    %c0_i32_1 = arith.constant 0 : i32
    return %c0_i32, %c0_i32_0 : i32, i32
  }
  func.func @transform_10(%arg0: i32) -> (i32, i32) {
    %c0_i32 = arith.constant 0 : i32
    %c0_i32_0 = arith.constant 0 : i32
    return %arg0, %c0_i32 : i32, i32
  }
  func.func @transform_11(%arg0: i32) -> (i32, i32) {
    %c0_i32 = arith.constant 0 : i32
    %c0_i32_0 = arith.constant 0 : i32
    return %arg0, %c0_i32 : i32, i32
  }
}

</mosaic_0001>

<bundles_post_ra>
// kernel: tpu_custom_call.1
= control target key start
LH: loop header
LB: loop body
LE: loop exit
PB: predicated region body
PF: predicated region fallthrough
CT: control target
= control target key end

     0   :  { %17 = vsyncpa [#allocation3], 0  ;;  %v49_v0 = vlaneseq  ;;  %v604_v2 = vmov 0   ;;  %v605_v3 = vmov 1966171168   ;;  %s804_s0 = inlined_call_operand.vmem [shape: bf16[2,8,32], index: 0, kind: input, shape index: {}]   ;;  %s805_s1 = inlined_call_operand.vmem [shape: s32[2,1], index: 1, kind: input, shape index: {}]   ;;  %s806_s2 = inlined_call_operand.vmem [shape: bf16[2,16,64], index: 2, kind: input, shape index: {}]   ;;  %s807_s3 = inlined_call_operand.vmem [shape: s32[2,1], index: 3, kind: input, shape index: {}]   ;;  %s808_s4 = inlined_call_operand.vmem [shape: bf16[32,128], index: 4, kind: input, shape index: {}]   ;;  %s809_s5 = inlined_call_operand.vmem [shape: f32[1,128], index: 5, kind: input, shape index: {}]   ;;  %s810_s6 = inlined_call_operand.vmem [shape: f32[1,128], index: 6, kind: input, shape index: {}]   ;;  %s811_s7 = inlined_call_operand.vmem [shape: f32[1,128], index: 7, kind: input, shape index: {}]   ;;  %s812_s8 = inlined_call_operand.vmem [shape: bf16[128,64], index: 8, kind: input, shape index: {}]   ;;  %s813_s9 = inlined_call_operand.vmem [shape: f32[1,64], index: 9, kind: input, shape index: {}]   ;;  %s814_s10 = inlined_call_operand.hbm [shape: f32[2,64], index: 10, kind: output, shape index: {0}]   ;;  %s815_s11 = inlined_call_operand.hbm [shape: f32[2,64], index: 11, kind: output, shape index: {1}]  }
   0x1   :  { %v138_v1 = vld [vmem:[%s805_s1] sm:$0x3]  ;;  %534 = vset.pattern.permute.xlu0 %v604_v2  ;;  %v53_v4 = vunpack.c.l.s4 %v605_v3  ;;  %535 = vset.pattern.permute.xlu1 %v604_v2 }
   0x2   :  { %v200_v5 = vcvt.s32.f32 %v138_v1  ;;  %v673_v6 = vshrl.u32 %v49_v0, 7 }
   0x3   :  { %v54_v7 = vunpack.c.0.s8 %v53_v4 }
   0x4   :  { %v201_v8 = vmax.f32 %v200_v5, 1.0  ;;  %v680_v11 = vsub.s32 0, %v673_v6 }
   0x5   :  { %v676_v9 = vsub.s32 %v54_v7, %v673_v6 }
   0x6   :  { %204 = vperm.xlu1 %535, %v201_v8  }
   0x7   :  { %v149_v10 = vrot.slane %v138_v1, %v676_v9 }
   0x9   :  { %v150_v12 = vcombine.high %v149_v10, %v149_v10 }
   0xa   :  { %18 = vsyncpa [#allocation5], 0  ;;  %v157_v14 = vrot.slane %v149_v10, %v676_v9  ;;  %v536_v17 = vld [vmem:[%s808_s4] sm:$0xff]   ;;  %v606_v18 = vmov 0.0   ;;  %v537_v19 = vld [vmem:[%s808_s4 + $0x8] sm:$0xff]   ;;  %vm607_vm0 = vmmov 0  }
   0xb   :  { %v164_v13 = vrot.slane %v150_v12, %v676_v9  ;;  %500 = vmatprep.subr.bf16.mxu0 %v606_v18  ;;  %508 = vmatprep.subr.bf16.mxu1 %v606_v18  ;;  %v484_v20 = vld [vmem:[%s804_s0] sm:$0xff]   ;;  %vm183_vm1 = vcmask 261120   ;;  %vm133_vm4 = vcmask 1041409   ;;  %vm288_vm5 = vcmask 1041408   ;;  %v539_v4 = vld [vmem:[%s812_s8 + $0x8] sm:$0xff]  }
   0xc   :  { %v168_v16 = vrot.slane %v157_v14, %v680_v11  ;;  %501 = vmatpush3.bf16.msra.mxu0 %v536_v17  ;;  %504 = vmatprep.mubr.msk.bf16.mxu0 %vm607_vm0, %v606_v18  ;;  %v486_v22 = vunpack.c.h.bf16 %v484_v20  ;;  %v485_v26 = vunpack.c.l.bf16 %v484_v20  ;;  %v460_v54 = vld [vmem:[%s809_s5] ss:$0 sm:$0xff]  ;;  %v540_v14 = vld [vmem:[%s812_s8 + $0x10] sm:$0xff]   ;;  %v545_v20 = vld [vmem:[%s812_s8 + $0x38] sm:$0xff]   ;;  %vm96_vm8 = vcmask 523264  }
   0xd   :  { %v172_v15 = vrot.slane %v164_v13, %v680_v11  ;;  %502 = vmatprep.subr.bf16.mxu0 %v606_v18  ;;  %524 = vmatprep.mubr.msk.bf16.mxu1 %vm607_vm0, %v606_v18  ;;  %v40_v61 = vld [vmem:[%s807_s3] sm:$0x3]  ;;  %vm136_vm11 = vcmask 517120  }
   0xe   :  { %v58_v62 = vrot.slane %v40_v61, %v676_v9  ;;  %v117_v1 = vcvt.s32.f32 %v40_v61  ;;  %v538_v3 = vld [vmem:[%s812_s8] sm:$0xff]  }
   0xf   :  { %177 = vperm.xlu0 %534, %v172_v15   ;;  %509 = vmatpush3.bf16.msra.mxu1 %v538_v3 }
  0x10   :  { %503 = vmatpush3.bf16.msra.mxu0 %v537_v19  ;;  %v66_v63 = vrot.slane %v58_v62, %v676_v9  ;;  %v118_v2 = vmax.f32 %v117_v1, 1.0  ;;  %510 = vmatprep.subr.bf16.mxu1 %v606_v18  ;;  %v59_v13 = vcombine.high %v58_v62, %v58_v62  ;;  %v542_v19 = vld [vmem:[%s812_s8 + $0x20] sm:$0xff]  }
  0x12   :  { %v77_v0 = vrot.slane %v66_v63, %v680_v11  ;;  %v73_v15 = vrot.slane %v59_v13, %v676_v9  ;;  %v543_v9 = vld [vmem:[%s812_s8 + $0x28] sm:$0xff]  }
  0x13   :  { %174 = vperm.xlu0 %534, %v168_v16   ;;  %511 = vmatpush3.bf16.msra.mxu1 %v539_v4  ;;  %v541_v16 = vld [vmem:[%s812_s8 + $0x18] sm:$0xff]  }
  0x14   :  { %512 = vmatprep.subr.bf16.mxu1 %v606_v18  ;;  %v81_v17 = vrot.slane %v73_v15, %v680_v11  ;;  %v544_v11 = vld [vmem:[%s812_s8 + $0x30] sm:$0xff]  }
  0x17   :  { %513 = vmatpush3.bf16.msra.mxu1 %v540_v14 }
  0x18   :  { %514 = vmatprep.subr.bf16.mxu1 %v606_v18 }
  0x1b   :  { %515 = vmatpush3.bf16.msra.mxu1 %v541_v16 }
  0x1c   :  { %516 = vmatprep.subr.bf16.mxu1 %v606_v18 }
  0x1f   :  { %517 = vmatpush3.bf16.msra.mxu1 %v542_v19 }
  0x20   :  { %518 = vmatprep.subr.bf16.mxu1 %v606_v18 }
  0x23   :  { %519 = vmatpush3.bf16.msra.mxu1 %v543_v9 }
  0x24   :  { %520 = vmatprep.subr.bf16.mxu1 %v606_v18 }
  0x27   :  { %521 = vmatpush3.bf16.msra.mxu1 %v544_v11 }
  0x28   :  { %522 = vmatprep.subr.bf16.mxu1 %v606_v18 }
  0x2b   :  { %523 = vmatpush3.bf16.msra.mxu1 %v545_v20 }
  0x85   :  { %v205_v21 = vpop.permute.xlu1 %204 }
  0x86   :  { %v206_v23 = vrot.slane %v205_v21, 1 }
  0x88   :  { %546 = vrcp.f32 %v206_v23 }
  0x89   :  { %548 = vrcp.f32 %v205_v21  ;;  %v476_v21 = vld [vmem:[%s806_s2] sm:$0xff]  }
  0x8e   :  { %v178_v24 = vpop.permute.xlu0 %177 }
  0x8f   :  { %vm180_vm2 = vcmp.lt.s32.totalorder %v673_v6, %v178_v24  ;;  %v477_v24 = vunpack.c.l.bf16 %v476_v21 }
  0x90   :  { %v182_v25 = vsel %vm180_vm2, %v486_v22, 0.0  ;;  %v51_v22 = vadd.s32 8, %v673_v6 }
  0x91   :  { %v191_v27 = vsel %vm183_vm1, %v182_v25, 0.0  ;;  %v478_v25 = vunpack.c.h.bf16 %v476_v21 }
  0x92   :  { %v192_v28 = vrot.slane %v191_v27, 4  ;;  %v175_v29 = vpop.permute.xlu0 %174  ;;  %v547_v39 = vpop.eup %546 }
  0x93   :  { %vm179_vm3 = vcmp.lt.s32.totalorder %v673_v6, %v175_v29  ;;  %v549_v46 = vpop.eup %548 }
  0x94   :  { %v193_v30 = vadd.f32 %v192_v28, %v191_v27  ;;  %v181_v31 = vsel %vm179_vm3, %v485_v26, 0.0 }
  0x95   :  { %v184_v32 = vsel %vm183_vm1, %v181_v31, 0.0 }
  0x96   :  { %v194_v33 = vrot.slane %v193_v30, 2  ;;  %v185_v34 = vrot.slane %v184_v32, 4 }
  0x98   :  { %v195_v35 = vadd.f32 %v194_v33, %v193_v30  ;;  %v186_v36 = vadd.f32 %v185_v34, %v184_v32  ;;  %v487_v33 = vld [vmem:[%s806_s2 + $0x8] sm:$0xff]  }
  0x9a   :  { %v196_v37 = vrot.slane %v195_v35, 1  ;;  %v187_v38 = vrot.slane %v186_v36, 2 }
  0x9c   :  { %v197_v40 = vadd.f32 %v196_v37, %v195_v35  ;;  %v188_v41 = vadd.f32 %v187_v38, %v186_v36  ;;  %v481_v35 = vunpack.c.l.bf16 %v487_v33  ;;  %v482_v36 = vunpack.c.h.bf16 %v487_v33 }
  0x9e   :  { %v212_v42 = vmul.f32 %v547_v39, %v197_v40  ;;  %v189_v43 = vrot.slane %v188_v41, 1 }
  0xa0   :  { %v190_v44 = vadd.f32 %v189_v43, %v188_v41  ;;  %v214_v45 = vpack.c.bf16 %v212_v42, %v212_v42 }
  0xa2   :  { %v210_v47 = vmul.f32 %v549_v46, %v190_v44  ;;  %v229_v48 = vunpack.c.l.b16 %v214_v45 }
  0xa4   :  { %v213_v49 = vpack.c.bf16 %v210_v47, %v210_v47  ;;  %v230_v51 = vrot.slane %v229_v48, 7 }
  0xa6   :  { %v228_v50 = vunpack.c.l.b16 %v213_v49  ;;  %v464_v49 = vld [vmem:[%s810_s6] ss:$0 sm:$0xff]  ;;  %s608_s6 = smov [#allocation4]  }
  0xa8   :  { %v231_v52 = vsel %vm133_vm4, %v230_v51, %v228_v50 }
  0xa9   :  { %v232_v53 = vpack.c.b16 %v231_v52, %v231_v52  ;;  %v465_v52 = vld [vmem:[%s811_s7] ss:$0 sm:$0xff]  ;;  %s448_s7 = sshll.u32 %s608_s6, 4  ;;  %s449_s7 = int_to_ptr.vmem [resolvable:$true] %s448_s7 }
  0xaa   :  { %s556_s24 = scalar_lea.vmem %s449_s7, 32  ;;  %p561_p1 = scmp.lt.s32.totalorder %s449_s7, %s449_s7 }
  0xab   :  { %505 = vmatmul.mubr.msk.bf16.vlgmr.msra.gmra.mrb[0].mxu0 %vm183_vm1, %v232_v53  ;;  %p557_p0 = scmp.ne.s32.totalorder %s449_s7, %s556_s24  ;;  %p562_p2 = scmp.lt.s32.totalorder %s556_s24, %s556_s24 }
  0xad   :  { %p563_p3 = por %p562_p2, %p561_p1 }
  0xaf   :  { %p564_p4 = pnand %p563_p3, %p557_p0 }
 0x17e   :  { %v282_v55 = vpop.f32.mrb[0].mxu0 }
 0x17f   :  { %v283_v56 = vadd.f32 %v460_v54, %v282_v55  ;;  %v506_v57 = vpop.f32.mrb[1].mxu0 }
 0x180   :  { %v285_v58 = vpop.f32.mrb[2].mxu0 }
 0x181   :  { %v507_v59 = vpop.f32.mrb[3].mxu0  ;;  %v289_v60 = vsel %vm288_vm5, %v283_v56, 0.0 }
 0x182   :  { %290 = vadd.xlane.f32.xlu1 %v289_v60 }
 0x193   :  { %83 = vperm.xlu1 %535, %v77_v0  }
 0x197   :  { %121 = vperm.xlu1 %535, %v118_v2  }
 0x20f   :  { %v291_v5 = vpop.xlane.xlu1 %290 }
 0x210   :  { %v293_v7 = vmul.f32 0.0078125, %v291_v5 }
 0x212   :  { %v724_v8 = vsub.f32 %v283_v56, %v293_v7 }
 0x213   :  { %v84_v23 = vpop.permute.xlu1 %83 }
 0x214   :  { %v295_v10 = vmul.f32 %v724_v8, %v724_v8  ;;  %vm88_vm6 = vcmp.lt.s32.totalorder %v673_v6, %v84_v23  ;;  %vm89_vm7 = vcmp.lt.s32.totalorder %v51_v22, %v84_v23 }
 0x215   :  { %v92_v26 = vsel %vm88_vm6, %v477_v24, 0.0  ;;  %v93_v18 = vsel %vm89_vm7, %v478_v25, 0.0 }
 0x216   :  { %v296_v12 = vsel %vm288_vm5, %v295_v10, 0.0  ;;  %v97_v27 = vsel %vm96_vm8, %v92_v26, 0.0  ;;  %v98_v28 = vsel %vm96_vm8, %v93_v18, 0.0 }
 0x217   :  { %297 = vadd.xlane.f32.xlu0 %v296_v12  ;;  %v99_v29 = vadd.f32 %v98_v28, %v97_v27  ;;  %v122_v38 = vpop.permute.xlu1 %121 }
 0x218   :  { %v123_v42 = vrot.slane %v122_v38, 1 }
 0x219   :  { %v100_v34 = vrot.slane %v99_v29, 4 }
 0x21b   :  { %v101_v37 = vadd.f32 %v100_v34, %v99_v29 }
 0x21d   :  { %v102_v45 = vrot.slane %v101_v37, 2 }
 0x21f   :  { %v103_v50 = vadd.f32 %v102_v45, %v101_v37 }
 0x221   :  { %v104_v55 = vrot.slane %v103_v50, 1 }
 0x223   :  { %v105_v61 = vadd.f32 %v104_v55, %v103_v50 }
 0x22d   :  { %86 = vperm.xlu0 %534, %v81_v17  }
 0x2a4   :  { %v298_v30 = vpop.xlane.xlu0 %297 }
 0x2a5   :  { %v299_v31 = vmul.f32 0.0078125, %v298_v30 }
 0x2a7   :  { %v300_v32 = vadd.f32 1e-05, %v299_v31 }
 0x2a9   :  { %550 = vrsqrt.f32 %v300_v32 }
 0x2aa   :  { %552 = vrcp.f32 %v123_v42 }
 0x2ab   :  { %554 = vrcp.f32 %v122_v38 }
 0x2ac   :  { %v87_v39 = vpop.permute.xlu0 %86 }
 0x2ad   :  { %vm90_vm9 = vcmp.lt.s32.totalorder %v673_v6, %v87_v39  ;;  %vm91_vm10 = vcmp.lt.s32.totalorder %v51_v22, %v87_v39 }
 0x2ae   :  { %v94_v40 = vsel %vm90_vm9, %v481_v35, 0.0  ;;  %v95_v41 = vsel %vm91_vm10, %v482_v36, 0.0 }
 0x2af   :  { %v106_v43 = vsel %vm96_vm8, %v94_v40, 0.0  ;;  %v107_v44 = vsel %vm96_vm8, %v95_v41, 0.0 }
 0x2b0   :  { %v108_v46 = vadd.f32 %v107_v44, %v106_v43 }
 0x2b2   :  { %v109_v47 = vrot.slane %v108_v46, 4 }
 0x2b3   :  { %v551_v48 = vpop.eup %550 }
 0x2b4   :  { %v110_v51 = vadd.f32 %v109_v47, %v108_v46  ;;  %v302_v6 = vmul.f32 %v551_v48, %v724_v8  ;;  %v553_v62 = vpop.eup %552 }
 0x2b5   :  { %v555_v0 = vpop.eup %554 }
 0x2b6   :  { %v111_v53 = vrot.slane %v110_v51, 2  ;;  %v310_v54 = vmul.f32 %v464_v49, %v302_v6  ;;  %v127_v1 = vmul.f32 %v555_v0, %v105_v61 }
 0x2b8   :  { %v112_v56 = vadd.f32 %v111_v53, %v110_v51  ;;  %v318_v57 = vadd.f32 %v465_v52, %v310_v54 }
 0x2ba   :  { %v113_v58 = vrot.slane %v112_v56, 1  ;;  %v319_v59 = vpack.c.bf16 %v318_v57, %v318_v57 }
 0x2bc   :  { %v114_v60 = vadd.f32 %v113_v58, %v112_v56  ;;  %525 = vmatmul.mubr.bf16.vlgmr.msra.gmra.mrb[0].mxu1 %v319_v59 }
 0x2be   :  { %v129_v63 = vmul.f32 %v553_v62, %v114_v60 }
 0x2c0   :  { %v132_v2 = vrot.slane %v129_v63, 7 }
 0x2c2   :  { %v134_v3 = vsel %vm133_vm4, %v132_v2, %v127_v1 }
 0x2c3   :  { %137 = vst.msk [vmem:[#allocation4] sm:$0x3] %vm136_vm11, %v134_v3 }
 0x2c4   :  { %567 = shalt.err (!%p564_p4)
}
 0x2c5   :  { %s568_s26 = scalar_lea.hbm %s815_s11, 32 }
 0x2c6   :  { %p569_p5 = scmp.ne.s32.totalorder %s815_s11, %s568_s26  ;;  %p572_p6 = scmp.lt.u32.totalorder %s568_s26, %s815_s11 }
 0x2c8   :  { %p574_p7 = pnand %p572_p6, %p569_p5 }
 0x2ca   :  { %577 = shalt.err (!%p574_p7)
}
 0x2cb   :  { %451 = dma.vmem_to_hbm [thread:$0]  %s449_s7, 32, %s815_s11, [#allocation5]   ;;  %v466_v4 = vld [vmem:[%s813_s9] ss:$0 sm:$0xff] }
 0x2cc   :  { %s609_s15 = smov [#allocation2]  }
 0x2cd   :  { %s438_s16 = sshll.u32 %s609_s15, 4  ;;  %s439_s16 = int_to_ptr.vmem [resolvable:$true] %s438_s16 }
 0x2ce   :  { %s578_s17 = scalar_lea.vmem %s439_s16, 32  ;;  %p583_p9 = scmp.lt.s32.totalorder %s439_s16, %s439_s16 }
 0x2cf   :  { %p579_p8 = scmp.ne.s32.totalorder %s439_s16, %s578_s17  ;;  %p584_p10 = scmp.lt.s32.totalorder %s578_s17, %s578_s17 }
 0x2d1   :  { %p585_p11 = por %p584_p10, %p583_p9 }
 0x2d3   :  { %p586_p12 = pnand %p585_p11, %p579_p8 }
 0x38f   :  { %v425_v5 = vpop.f32.mrb[0].mxu1 }
 0x390   :  { %v426_v7 = vadd.f32 %v466_v4, %v425_v5  ;;  %v526_v8 = vpop.f32.mrb[1].mxu1 }
 0x391   :  { %v428_v10 = vpop.f32.mrb[2].mxu1 }
 0x392   :  { %v527_v12 = vpop.f32.mrb[3].mxu1  ;;  %431 = vst.msk [vmem:[#allocation2] sm:$0x3] %vm136_vm11, %v426_v7 }
 0x393   :  { %589 = shalt.err (!%p586_p12)
}
 0x394   :  { %s590_s9 = scalar_lea.hbm %s814_s10, 32 }
 0x395   :  { %p591_p13 = scmp.ne.s32.totalorder %s814_s10, %s590_s9  ;;  %p594_p0 = scmp.lt.u32.totalorder %s590_s9, %s814_s10 }
 0x397   :  { %p596_p1 = pnand %p594_p0, %p591_p13 }
 0x399   :  { %599 = shalt.err (!%p596_p1)
}
 0x39a   :  { %441 = dma.vmem_to_hbm [thread:$0]  %s439_s16, 32, %s814_s10, [#allocation3]  }
 0x39b   :  { %600 = dma.done.wait [#allocation3], 32  }
 0x39c   :  { %601 = vsyncadd [#allocation3], 4294967264 }
 0x39d   :  { %602 = dma.done.wait [#allocation5], 32  }
 0x39e   :  { %603 = vsyncadd [#allocation5], 4294967264 }
 0x39f   :  { %458 = vsyncpa [#allocation3], 1 }
 0x3a0   :  { %459 = vsyncpa [#allocation5], 1 }

</bundles_post_ra>
